<compile_context>
chip_gen: v7x
topology: tpu7x:2x2x1
jax: 0.10.0
libtpu: 0.0.40
codegen_flags: <defaults>
</compile_context>

<pallas_src>
import functools
import math

import jax
import jax.numpy as jnp
import numpy as np
from jax.experimental import pallas as pl
from jax.experimental.pallas import tpu as pltpu


def _image_classifier_kernel(x_ref, wcat_ref, brow_ref, wfc_ref, bfc_ref,
                             out_ref, lhs_ref, *, kh, h, wpc_pad, inv_hw):
    """One grid step = one image: fused conv(3x3,SAME) + bias/ReLU + GAP + Linear."""
    xblk = x_ref[0]                                    # (Hp_pad, WpC_pad) bf16

    # Pack the kh row-shifted windows side-by-side along K (lane-aligned 128
    # chunks) so the whole conv is a single MXU matmul.
    for ky in range(kh):                               # static unroll (kh = 3)
        lhs_ref[:, ky * wpc_pad:(ky + 1) * wpc_pad] = xblk[ky:ky + h, :]

    # conv: (h, kh*WpC_pad) @ (kh*WpC_pad, W*C1) -> (h, W*C1), f32 accumulation.
    conv = jnp.dot(lhs_ref[...], wcat_ref[...],
                   preferred_element_type=jnp.float32)
    conv = jnp.maximum(conv + brow_ref[...], 0.0)      # bias + ReLU (f32)

    # Global average pool over rows (the W-axis pool is folded into the fc
    # weights), then the classifier Linear + bias, lane-dense 128-wide output.
    pooled = jnp.sum(conv, axis=0, keepdims=True) * inv_hw        # (1, W*C1)
    pred = jnp.dot(pooled, wfc_ref[...],
                   preferred_element_type=jnp.float32) + bfc_ref[...]
    out_ref[0] = pred                                  # (1, T_pad)


def _prepare_weights(params, W, wpc_pad, t_pad):
    """One-time host prep: banded conv weights stacked along K + pool-folded fc."""
    w = np.asarray(params["w_conv"], np.float32)       # (C1, C, KH, KW)
    b = np.asarray(params["b_conv"], np.float32)       # (C1,)
    wf = np.asarray(params["w_fc"], np.float32)        # (T, C1)
    bf = np.asarray(params["b_fc"], np.float32)        # (T,)
    C1, C, KH, KW = w.shape
    T = wf.shape[0]

    # wcat[ky*wpc_pad + j*C + c, dx*C1 + c1] = w[c1, c, ky, j - dx]
    wcat = np.zeros((KH * wpc_pad, W * C1), np.float32)
    for ky in range(KH):
        for dx in range(W):
            for kx in range(KW):
                j = dx + kx                            # padded input column
                wcat[ky * wpc_pad + j * C: ky * wpc_pad + (j + 1) * C,
                     dx * C1:(dx + 1) * C1] = w[:, :, ky, kx].T
    brow = np.tile(b, W).reshape(1, W * C1)

    # fc weights tiled over the W axis (folds the W-axis pool into the matmul),
    # output padded to t_pad lanes.
    wfc = np.zeros((W * C1, t_pad), np.float32)
    wfc[:, :T] = np.tile(wf.T, (W, 1))
    bfc = np.zeros((1, t_pad), np.float32)
    bfc[0, :T] = bf
    return (jnp.asarray(wcat, jnp.bfloat16), jnp.asarray(brow, jnp.float32),
            jnp.asarray(wfc, jnp.float32), jnp.asarray(bfc, jnp.float32))


@functools.partial(jax.jit, static_argnums=(5, 6, 7, 8))
def _forward_jit(x, wcat, brow, wfc, bfc, kh, pad, wp_lane, hp_pad):
    B, C, H, W = x.shape
    wpc_pad = wp_lane * C
    t_pad = bfc.shape[1]

    # Fused input prep (single jit): NCHW -> NHWC, one pad covering the conv
    # halo + lane/sublane alignment, flatten (W,C) into lanes, bf16 cast.
    x_nhwc = jnp.transpose(x, (0, 2, 3, 1))                               # (B,H,W,C)
    x_p = jnp.pad(x_nhwc, ((0, 0),
                           (pad, hp_pad - H - pad),
                           (pad, wp_lane - W - pad),
                           (0, 0)))                                       # (B,Hp_pad,Wp_lane,C)
    x_in = x_p.reshape(B, hp_pad, wpc_pad).astype(jnp.bfloat16)

    kernel = functools.partial(_image_classifier_kernel, kh=kh, h=H,
                               wpc_pad=wpc_pad, inv_hw=1.0 / float(H * W))

    grid_spec = pltpu.PrefetchScalarGridSpec(
        num_scalar_prefetch=0,
        grid=(B,),
        in_specs=[
            # one padded image per grid step (double-buffered by the pipeline)
            pl.BlockSpec((1, hp_pad, wpc_pad), lambda b: (b, 0, 0)),
            # constant operands: fetched once (constant block index)
            pl.BlockSpec(wcat.shape, lambda b: (0, 0)),
            pl.BlockSpec(brow.shape, lambda b: (0, 0)),
            pl.BlockSpec(wfc.shape, lambda b: (0, 0)),
            pl.BlockSpec(bfc.shape, lambda b: (0, 0)),
        ],
        out_specs=pl.BlockSpec((1, 1, t_pad), lambda b: (b, 0, 0)),
        scratch_shapes=[pltpu.VMEM((H, kh * wpc_pad), jnp.bfloat16)],     # packed lhs
    )

    return pl.pallas_call(
        kernel,
        out_shape=jax.ShapeDtypeStruct((B, 1, t_pad), jnp.float32),
        grid_spec=grid_spec,
        compiler_params=pltpu.CompilerParams(
            dimension_semantics=("parallel",),
            vmem_limit_bytes=32 * 1024 * 1024),
    )(x_in, wcat, brow, wfc, bfc)


def image_classifier_forward(x, params):
    """x: (B, C, H, W) float32 (NCHW).  Returns logits (B, num_targets)."""
    B, C, H, W = x.shape
    C1, _, KH, KW = params["w_conv"].shape
    T = params["w_fc"].shape[0]
    pad = KH // 2                                     # SAME padding, stride 1
    Wp = W + 2 * pad

    lane = 128
    step = lane // math.gcd(C, lane)
    wp_lane = ((Wp + step - 1) // step) * step        # lane-pad Wp*C to a multiple of 128
    hp_pad = ((H + 2 * pad + 15) // 16) * 16          # bf16 sublane-aligned row count
    t_pad = ((T + lane - 1) // lane) * lane           # lane-dense classifier output

    wcat, brow, wfc, bfc = _prepare_weights(params, W, wp_lane * C, t_pad)
    out = _forward_jit(x, wcat, brow, wfc, bfc, KH, pad, wp_lane, hp_pad)
    return out[:, 0, :T]


def reference_forward(x, params):
    """Pure-JAX f32 reference mirroring the PyTorch forward."""
    w_conv, b_conv, w_fc, b_fc = (params["w_conv"], params["b_conv"],
                                  params["w_fc"], params["b_fc"])
    conv = jax.lax.conv_general_dilated(
        x, w_conv, window_strides=(1, 1), padding="SAME",
        dimension_numbers=("NCHW", "OIHW", "NCHW"))
    conv = jax.nn.relu(conv + b_conv[None, :, None, None])
    feat = jnp.mean(conv, axis=(2, 3))                # global avg pool
    return feat @ w_fc.T + b_fc                       # nn.Linear


if __name__ == "__main__":
    # Small, module-consistent shapes (B is a multiple of 2 for v7x megacore).
    B, C, H, W = 2, 4, 16, 16          # input images (NCHW)
    feature_dim = 32                   # encoder output channels
    num_targets = 5                    # cfg.model.vision.num_targets
    KH = KW = 3

    key = jax.random.PRNGKey(0)
    k_x, k_wc, k_bc, k_wf, k_bf = jax.random.split(key, 5)

    x = jax.random.normal(k_x, (B, C, H, W), dtype=jnp.float32)
    params = {
        "w_conv": 0.1 * jax.random.normal(k_wc, (feature_dim, C, KH, KW), jnp.float32),
        "b_conv": 0.1 * jax.random.normal(k_bc, (feature_dim,), jnp.float32),
        "w_fc":   0.1 * jax.random.normal(k_wf, (num_targets, feature_dim), jnp.float32),
        "b_fc":   0.1 * jax.random.normal(k_bf, (num_targets,), jnp.float32),
    }

    pred = jax.block_until_ready(image_classifier_forward(x, params))
    ref = jax.block_until_ready(reference_forward(x, params))

    assert pred.shape == (B, num_targets)
    # Tolerance accounts for bf16 MXU inputs (f32 accumulation) vs the f32 reference.
    np.testing.assert_allclose(np.asarray(pred), np.asarray(ref), rtol=2e-2, atol=2e-2)
    print("KERNEL_OK")
</pallas_src>

<mosaic_0001>
module attributes {stable_mosaic.version = 11 : i64} {
  func.func @_image_classifier_kernel(%arg0: i32, %arg1: memref<1x32x128xbf16, #tpu.memory_space<vmem>>, %arg2: memref<384x512xbf16, #tpu.memory_space<vmem>>, %arg3: memref<1x512xf32, #tpu.memory_space<vmem>>, %arg4: memref<512x128xf32, #tpu.memory_space<vmem>>, %arg5: memref<1x128xf32, #tpu.memory_space<vmem>>, %arg6: memref<1x1x128xf32, #tpu.memory_space<vmem>>, %arg7: memref<16x384xbf16, #tpu.memory_space<vmem>>) attributes {dimension_semantics = [#tpu.dimension_semantics<parallel>], iteration_bounds = array<i64: 2>, scalar_prefetch = 0 : i64, scratch_operands = 1 : i64, tpu.core_type = #tpu.core_type<tc>, window_params = [{transform_indices = @transform_0, window_bounds = array<i64: 1, 32, 128>}, {pipeline_mode = #tpu.pipeline_mode<synchronous>, transform_indices = @transform_1, window_bounds = array<i64: 384, 512>}, {pipeline_mode = #tpu.pipeline_mode<synchronous>, transform_indices = @transform_2, window_bounds = array<i64: 1, 512>}, {pipeline_mode = #tpu.pipeline_mode<synchronous>, transform_indices = @transform_3, window_bounds = array<i64: 512, 128>}, {pipeline_mode = #tpu.pipeline_mode<synchronous>, transform_indices = @transform_4, window_bounds = array<i64: 1, 128>}, {transform_indices = @transform_5, window_bounds = array<i64: 1, 1, 128>}]} {
    %c0 = arith.constant 0 : index
    %c0_0 = arith.constant 0 : index
    %c0_1 = arith.constant 0 : index
    %0 = vector.load %arg1[%c0, %c0_0, %c0_1] : memref<1x32x128xbf16, #tpu.memory_space<vmem>>, vector<1x32x128xbf16>
    %1 = vector.shape_cast %0 : vector<1x32x128xbf16> to vector<32x128xbf16>
    %2 = vector.extract_strided_slice %1 {offsets = [0, 0], sizes = [16, 128], strides = [1, 1]} : vector<32x128xbf16> to vector<16x128xbf16>
    %c0_2 = arith.constant 0 : index
    %c0_3 = arith.constant 0 : index
    %3 = vector.load %arg7[%c0_2, %c0_3] : memref<16x384xbf16, #tpu.memory_space<vmem>>, vector<16x128xbf16>
    tpu.vector_store %arg7[%c0_2, %c0_3], %2 {strides = array<i32>} : memref<16x384xbf16, #tpu.memory_space<vmem>>, vector<16x128xbf16>,
    %4 = vector.extract_strided_slice %1 {offsets = [1, 0], sizes = [16, 128], strides = [1, 1]} : vector<32x128xbf16> to vector<16x128xbf16>
    %c0_4 = arith.constant 0 : index
    %c128 = arith.constant 128 : index
    %5 = vector.load %arg7[%c0_4, %c128] : memref<16x384xbf16, #tpu.memory_space<vmem>>, vector<16x128xbf16>
    tpu.vector_store %arg7[%c0_4, %c128], %4 {strides = array<i32>} : memref<16x384xbf16, #tpu.memory_space<vmem>>, vector<16x128xbf16>,
    %6 = vector.extract_strided_slice %1 {offsets = [2, 0], sizes = [16, 128], strides = [1, 1]} : vector<32x128xbf16> to vector<16x128xbf16>
    %c0_5 = arith.constant 0 : index
    %c256 = arith.constant 256 : index
    %7 = vector.load %arg7[%c0_5, %c256] : memref<16x384xbf16, #tpu.memory_space<vmem>>, vector<16x128xbf16>
    tpu.vector_store %arg7[%c0_5, %c256], %6 {strides = array<i32>} : memref<16x384xbf16, #tpu.memory_space<vmem>>, vector<16x128xbf16>,
    %c0_6 = arith.constant 0 : index
    %c0_7 = arith.constant 0 : index
    %8 = vector.load %arg7[%c0_6, %c0_7] : memref<16x384xbf16, #tpu.memory_space<vmem>>, vector<16x384xbf16>
    %c0_8 = arith.constant 0 : index
    %c0_9 = arith.constant 0 : index
    %9 = vector.load %arg2[%c0_8, %c0_9] : memref<384x512xbf16, #tpu.memory_space<vmem>>, vector<384x512xbf16>
    %cst = arith.constant dense<0.000000e+00> : vector<16x512xf32>
    %10 = tpu.matmul %8, %9, %cst {dimension_numbers = #tpu.dot_dimension_numbers<[1], [0], [0], [1], [0, 0, 1, 1], [], []>} : vector<16x384xbf16>, vector<384x512xbf16>, vector<16x512xf32> -> vector<16x512xf32>
    %c0_10 = arith.constant 0 : index
    %c0_11 = arith.constant 0 : index
    %11 = vector.load %arg3[%c0_10, %c0_11] : memref<1x512xf32, #tpu.memory_space<vmem>>, vector<1x512xf32>
    %12 = vector.broadcast %11 : vector<1x512xf32> to vector<16x512xf32>
    %13 = arith.addf %10, %12 : vector<16x512xf32>
    %cst_12 = arith.constant 0.000000e+00 : f32
    %14 = vector.broadcast %cst_12 : f32 to vector<16x512xf32>
    %15 = arith.maximumf %13, %14 : vector<16x512xf32>
    %cst_13 = arith.constant dense<0.000000e+00> : vector<512xf32>
    %16 = vector.multi_reduction <add>, %15, %cst_13 [0] : vector<16x512xf32> to vector<512xf32>
    %17 = vector.shape_cast %16 : vector<512xf32> to vector<1x512xf32>
    %cst_14 = arith.constant 3.906250e-03 : f32
    %18 = vector.broadcast %cst_14 : f32 to vector<1x512xf32>
    %19 = arith.mulf %17, %18 : vector<1x512xf32>
    %c0_15 = arith.constant 0 : index
    %c0_16 = arith.constant 0 : index
    %20 = vector.load %arg4[%c0_15, %c0_16] : memref<512x128xf32, #tpu.memory_space<vmem>>, vector<512x128xf32>
    %cst_17 = arith.constant dense<0.000000e+00> : vector<1x128xf32>
    %21 = tpu.matmul %19, %20, %cst_17 {dimension_numbers = #tpu.dot_dimension_numbers<[1], [0], [0], [1], [0, 0, 1, 1], [], []>} : vector<1x512xf32>, vector<512x128xf32>, vector<1x128xf32> -> vector<1x128xf32>
    %c0_18 = arith.constant 0 : index
    %c0_19 = arith.constant 0 : index
    %22 = vector.load %arg5[%c0_18, %c0_19] : memref<1x128xf32, #tpu.memory_space<vmem>>, vector<1x128xf32>
    %23 = arith.addf %21, %22 : vector<1x128xf32>
    %c0_20 = arith.constant 0 : index
    %c0_21 = arith.constant 0 : index
    %c0_22 = arith.constant 0 : index
    %24 = vector.load %arg6[%c0_20, %c0_21, %c0_22] : memref<1x1x128xf32, #tpu.memory_space<vmem>>, vector<1x1x128xf32>
    %25 = vector.shape_cast %24 : vector<1x1x128xf32> to vector<1x128xf32>
    %26 = vector.shape_cast %23 : vector<1x128xf32> to vector<1x1x128xf32>
    tpu.vector_store %arg6[%c0_20, %c0_21, %c0_22], %26 {strides = array<i32>} : memref<1x1x128xf32, #tpu.memory_space<vmem>>, vector<1x1x128xf32>,
    return
  }
  func.func @transform_0(%arg0: i32) -> (i32, i32, i32) {
    %c0_i32 = arith.constant 0 : i32
    %c0_i32_0 = arith.constant 0 : i32
    %c0_i32_1 = arith.constant 0 : i32
    return %arg0, %c0_i32, %c0_i32_0 : i32, i32, i32
  }
  func.func @transform_1(%arg0: i32) -> (i32, i32) {
    %c0_i32 = arith.constant 0 : i32
    %c0_i32_0 = arith.constant 0 : i32
    %c0_i32_1 = arith.constant 0 : i32
    return %c0_i32, %c0_i32_0 : i32, i32
  }
  func.func @transform_2(%arg0: i32) -> (i32, i32) {
    %c0_i32 = arith.constant 0 : i32
    %c0_i32_0 = arith.constant 0 : i32
    %c0_i32_1 = arith.constant 0 : i32
    return %c0_i32, %c0_i32_0 : i32, i32
  }
  func.func @transform_3(%arg0: i32) -> (i32, i32) {
    %c0_i32 = arith.constant 0 : i32
    %c0_i32_0 = arith.constant 0 : i32
    %c0_i32_1 = arith.constant 0 : i32
    return %c0_i32, %c0_i32_0 : i32, i32
  }
  func.func @transform_4(%arg0: i32) -> (i32, i32) {
    %c0_i32 = arith.constant 0 : i32
    %c0_i32_0 = arith.constant 0 : i32
    %c0_i32_1 = arith.constant 0 : i32
    return %c0_i32, %c0_i32_0 : i32, i32
  }
  func.func @transform_5(%arg0: i32) -> (i32, i32, i32) {
    %c0_i32 = arith.constant 0 : i32
    %c0_i32_0 = arith.constant 0 : i32
    %c0_i32_1 = arith.constant 0 : i32
    return %arg0, %c0_i32, %c0_i32_0 : i32, i32, i32
  }
}

</mosaic_0001>

<bundles_post_ra>
// kernel: _forward_jit.1
= control target key start
LH: loop header
LB: loop body
LE: loop exit
PB: predicated region body
PF: predicated region fallthrough
CT: control target
= control target key end

     0   :  { %10 = vsyncpa [#allocation4], 0  ;;  %s2305_s0 = inlined_call_operand.vmem [shape: bf16[2,32,128], index: 0, kind: input, shape index: {}]   ;;  %s2306_s1 = inlined_call_operand.hbm [shape: bf16[384,512], index: 1, kind: input, shape index: {}]   ;;  %s2307_s2 = inlined_call_operand.vmem [shape: f32[1,512], index: 2, kind: input, shape index: {}]   ;;  %s2308_s3 = inlined_call_operand.vmem [shape: f32[512,128], index: 3, kind: input, shape index: {}]   ;;  %s2309_s4 = inlined_call_operand.vmem [shape: f32[1,128], index: 4, kind: input, shape index: {}]   ;;  %s2310_s5 = inlined_call_operand.hbm [shape: f32[2,1,128], index: 5, kind: output, shape index: {}]  }
   0x1   :  { %11 = vsyncpa [#allocation5], 0 }
   0x2   :  { %13 = vsyncpa [#allocation5 + $0x1], 0  ;;  %s1961_s18 = smov 0   ;;  %s1963_s19 = smov 0  }
   0x3   :  { %s1965_s20 = smov 0   ;;  %s1967_s21 = smov 0  }
   0x4 LB: > { %s1982_s22 = sadd.s32 4294967295, %s1924_s21   ;;  %s1371_s23 = sadd.s32 4294967294, %s1924_s21   ;;  %s1924_s21 = sphi %s1967_s21, %s2326_s21   ;;  %s1920_s20 = sphi %s1965_s20, %s2325_s20   ;;  %s1916_s19 = sphi %s1963_s19, %s2324_s19   ;;  %s1912_s18 = sphi %s1961_s18, %s2323_s18  }
   0x5   : > { %s1986_s24 = sadd.s32 1, %s1924_s21   ;;  %s136_s25 = sadd.s32 1, %s1920_s20 }
   0x6   : > { %s133_s26 = ssub.s32 %s1924_s21, %s1986_s24  ;;  %p146_p0 = scmp.ne.s32.totalorder %s1920_s20, %s1916_s19 }
   0x7   : > { %p134_p1 = scmp.eq.s32.totalorder %s133_s26, 0  ;;  %p147_p2 = scmp.eq.s32.totalorder %s1982_s22, 1 }
   0x8   : > { %p152_p3 = scmp.ne.s32.totalorder %s1916_s19, %s1912_s18  ;;  %p153_p4 = scmp.eq.s32.totalorder %s1371_s23, 1 }
   0x9   : > { %s1997_s27 = scalar_select %p134_p1, %s1920_s20, %s136_s25  }
   0xa   : > { %p1999_p5 = por %p147_p2, %p146_p0  ;;  %p2003_p6 = por %p153_p4, %p152_p3 }
   0xb   : > { %p1372_p7 = scmp.ge.s32.totalorder %s1924_s21, 1  ;;  %p160_p8 = scmp.lt.s32.totalorder %s1924_s21, 3 }
   0xc   : > { %s2314_s28 = scalar_select %p1999_p5, 1, 0 }
   0xd   : > { %s2315_s29 = scalar_select %p2003_p6, 1, 0 }
   0xe   : > { %p2311_p9 = scmp.eq.s32.totalorder %s1982_s22, 0  ;;  %p2010_p10 = pnand %p1372_p7, %p160_p8 }
   0xf   : > { %s1926_s6 = smov [#allocation3]   ;;  %s1830_s11 = scalar_lea.hbm %s2306_s1, 12288 }
  0x10   : > { %s2316_s30 = scalar_select %p2010_p10, 1, 0 }
  0x11   : > { %s172_s7 = sshll.u32 %s1926_s6, 4  ;;  %p1637_p11 = pneg %p2010_p10  ;;  %s173_s7 = int_to_ptr.vmem [resolvable:$true] %s172_s7 }
  0x12   : > { %p1831_p13 = scmp.ne.s32.totalorder %s2306_s1, %s1830_s11  ;;  %p1837_p3 = scmp.lt.u32.totalorder %s1830_s11, %s2306_s1 }
  0x13   : > { %p2018_p12 = pnand %p2311_p9, %p1637_p11 }
  0x15   : > { %p1832_p0 = pneg %p2018_p12 }
  0x17   : > { %p1833_p1 = pnand %p1832_p0, %p1831_p13 }
  0x19   : > { %p1834_p2 = pneg %p1833_p1 }
  0x1b   : > { %p1839_p4 = pnand %p1837_p3, %p1834_p2 }
  0x1d   : > { %1842 = shalt.err (!%p1839_p4)
}
  0x1e   : > { %s1843_s16 = scalar_lea.vmem %s173_s7, 12288  ;;  %p1851_p9 = scmp.lt.s32.totalorder %s173_s7, %s173_s7 }
  0x1f   : > { %p1844_p7 = scmp.ne.s32.totalorder %s173_s7, %s1843_s16  ;;  %p1852_p6 = scmp.lt.s32.totalorder %s1843_s16, %s1843_s16 }
  0x21   : > { %p1846_p8 = pnand %p1844_p7, %p1832_p0  ;;  %p1853_p5 = por %p1852_p6, %p1851_p9 }
  0x23   : > { %p1847_p11 = pneg %p1846_p8 }
  0x25   : > { %p1854_p10 = pnand %p1853_p5, %p1847_p11 }
  0x27   : > { %1857 = shalt.err (!%p1854_p10)
}
  0x28   : > { %s1927_s17 = smov 256   ;;  %s1928_s23 = smov 16  }
  0x29   : > { %1640 = dma.hbm_to_vmem [thread:$0]  (!%p2018_p12), %s2306_s1, 12288, %s173_s7, [#allocation4], %s1927_s17, %s1927_s17, %s1928_s23  }
  0x2a   : > { %p2318_p13 = scmp.ne.s32.totalorder %s2316_s30, 0 }
  0x2b   : > { %p2319_p1 = scmp.eq.s32.totalorder (!%p2318_p13), %s1982_s22, 0 }
  0x2c   : > { %205 = sbr.rel (%p2318_p13) target bundleno = 618 (0x26a), region = 40 }
  0x33   : > { %1903 = dma.done.wait (%p2319_p1), [#allocation4], 12288   ;;  %p2320_p0 = pmov %p2319_p1 }
  0x34   : > { %v1684_v0 = vld [vmem:[#allocation3 + $0x4] ss:$16 sps:$4 sm:$0xff]   ;;  %v1686_v1 = vld [vmem:[#allocation3 + $0xc] ss:$16 sps:$4 sm:$0xff]   ;;  %v1688_v2 = vld [vmem:[#allocation3] ss:$16 sps:$4 sm:$0xff]  }
  0x35   : > { %1905 = vsyncadd (%p2320_p0), [#allocation4], 4294955008  ;;  %873 = vmatprep.subr.bf16.mxu0 %v1684_v0  ;;  %v1689_v3 = vld [vmem:[#allocation3 + $0x8] ss:$16 sps:$4 sm:$0xff]   ;;  %959 = vmatprep.subr.bf16.mxu1 %v1686_v1  ;;  %v1690_v4 = vld [vmem:[#allocation3 + $0x24] ss:$16 sps:$4 sm:$0xff]  }
  0x36   : > { %874 = vmatpush1.bf16.msra.mxu0 %v1688_v2  ;;  %960 = vmatpush1.bf16.msra.mxu1 %v1689_v3  ;;  %v1692_v5 = vld [vmem:[#allocation3 + $0x2c] ss:$16 sps:$4 sm:$0xff]   ;;  %v1694_v6 = vld [vmem:[#allocation3 + $0x20] ss:$16 sps:$4 sm:$0xff]   ;;  %v1695_v7 = vld [vmem:[#allocation3 + $0x28] ss:$16 sps:$4 sm:$0xff]  }
  0x37   : > { %875 = vmatprep.subr.bf16.mxu0 %v1690_v4  ;;  %961 = vmatprep.subr.bf16.mxu1 %v1692_v5  ;;  %v1696_v8 = vld [vmem:[#allocation3 + $0x44] ss:$16 sps:$4 sm:$0xff]   ;;  %v1698_v9 = vld [vmem:[#allocation3 + $0x4c] ss:$16 sps:$4 sm:$0xff]   ;;  %v1700_v10 = vld [vmem:[#allocation3 + $0x40] ss:$16 sps:$4 sm:$0xff]  }
  0x38   : > { %v1701_v11 = vld [vmem:[#allocation3 + $0x48] ss:$16 sps:$4 sm:$0xff]   ;;  %v1702_v12 = vld [vmem:[#allocation3 + $0x64] ss:$16 sps:$4 sm:$0xff]   ;;  %v1704_v13 = vld [vmem:[#allocation3 + $0x6c] ss:$16 sps:$4 sm:$0xff]  }
  0x39   : > { %v1706_v14 = vld [vmem:[#allocation3 + $0x60] ss:$16 sps:$4 sm:$0xff]   ;;  %v1707_v15 = vld [vmem:[#allocation3 + $0x68] ss:$16 sps:$4 sm:$0xff]   ;;  %v1708_v16 = vld [vmem:[#allocation3 + $0x84] ss:$16 sps:$4 sm:$0xff]  }
  0x3a   : > { %876 = vmatpush1.bf16.msra.mxu0 %v1694_v6  ;;  %962 = vmatpush1.bf16.msra.mxu1 %v1695_v7  ;;  %v1710_v17 = vld [vmem:[#allocation3 + $0x8c] ss:$16 sps:$4 sm:$0xff]   ;;  %v1712_v18 = vld [vmem:[#allocation3 + $0x80] ss:$16 sps:$4 sm:$0xff]   ;;  %v1713_v19 = vld [vmem:[#allocation3 + $0x88] ss:$16 sps:$4 sm:$0xff]  }
  0x3b   : > { %877 = vmatprep.subr.bf16.mxu0 %v1696_v8  ;;  %963 = vmatprep.subr.bf16.mxu1 %v1698_v9  ;;  %v1714_v20 = vld [vmem:[#allocation3 + $0xa4] ss:$16 sps:$4 sm:$0xff]   ;;  %v1716_v21 = vld [vmem:[#allocation3 + $0xac] ss:$16 sps:$4 sm:$0xff]   ;;  %v1718_v22 = vld [vmem:[#allocation3 + $0xa0] ss:$16 sps:$4 sm:$0xff]  }
  0x3c   : > { %v1719_v23 = vld [vmem:[#allocation3 + $0xa8] ss:$16 sps:$4 sm:$0xff]   ;;  %v1720_v24 = vld [vmem:[#allocation3 + $0xc4] ss:$16 sps:$4 sm:$0xff]   ;;  %v1722_v25 = vld [vmem:[#allocation3 + $0xcc] ss:$16 sps:$4 sm:$0xff]  }
  0x3d   : > { %v1724_v26 = vld [vmem:[#allocation3 + $0xc0] ss:$16 sps:$4 sm:$0xff]   ;;  %v1725_v27 = vld [vmem:[#allocation3 + $0xc8] ss:$16 sps:$4 sm:$0xff]   ;;  %v1726_v28 = vld [vmem:[#allocation3 + $0xe4] ss:$16 sps:$4 sm:$0xff]  }
  0x3e   : > { %878 = vmatpush1.bf16.msra.mxu0 %v1700_v10  ;;  %964 = vmatpush1.bf16.msra.mxu1 %v1701_v11  ;;  %v1728_v29 = vld [vmem:[#allocation3 + $0xec] ss:$16 sps:$4 sm:$0xff]   ;;  %v1730_v30 = vld [vmem:[#allocation3 + $0xe0] ss:$16 sps:$4 sm:$0xff]   ;;  %v1731_v31 = vld [vmem:[#allocation3 + $0xe8] ss:$16 sps:$4 sm:$0xff]  }
  0x3f   : > { %879 = vmatprep.subr.bf16.mxu0 %v1702_v12  ;;  %965 = vmatprep.subr.bf16.mxu1 %v1704_v13  ;;  %v1732_v32 = vld [vmem:[#allocation3 + $0x104] ss:$16 sps:$4 sm:$0xff]   ;;  %v1734_v33 = vld [vmem:[#allocation3 + $0x10c] ss:$16 sps:$4 sm:$0xff]   ;;  %p232_p5 = scmp.lt.s32.totalorder %s1982_s22, 1  ;;  %vm266_vm1 = vcmask 1046528  }
  0x40   : > { %v1736_v34 = vld [vmem:[#allocation3 + $0x100] ss:$16 sps:$4 sm:$0xff]   ;;  %v1737_v35 = vld [vmem:[#allocation3 + $0x108] ss:$16 sps:$4 sm:$0xff]   ;;  %v1738_v36 = vld [vmem:[#allocation3 + $0x124] ss:$16 sps:$4 sm:$0xff]  }
  0x41   : > { %v1740_v37 = vld [vmem:[#allocation3 + $0x12c] ss:$16 sps:$4 sm:$0xff]   ;;  %s233_s30 = scalar_select %p232_p5, %s1982_s22, 1  ;;  %v1742_v38 = vld [vmem:[#allocation3 + $0x120] ss:$16 sps:$4 sm:$0xff]  }
  0x42   : > { %880 = vmatpush1.bf16.msra.mxu0 %v1706_v14  ;;  %966 = vmatpush1.bf16.msra.mxu1 %v1707_v15  ;;  %v1743_v39 = vld [vmem:[#allocation3 + $0x128] ss:$16 sps:$4 sm:$0xff]   ;;  %v1744_v40 = vld [vmem:[#allocation3 + $0x144] ss:$16 sps:$4 sm:$0xff]   ;;  %v1746_v41 = vld [vmem:[#allocation3 + $0x14c] ss:$16 sps:$4 sm:$0xff]  }
  0x43   : > { %881 = vmatprep.subr.bf16.mxu0 %v1708_v16  ;;  %967 = vmatprep.subr.bf16.mxu1 %v1710_v17  ;;  %s1480_s6 = sshll.u32 %s233_s30, 4  ;;  %v1748_v42 = vld [vmem:[#allocation3 + $0x140] ss:$16 sps:$4 sm:$0xff]   ;;  %v1749_v43 = vld [vmem:[#allocation3 + $0x148] ss:$16 sps:$4 sm:$0xff]   ;;  %s230_s12 = sand.u32 1, %s1916_s19  }
  0x44   : > { %v1750_v44 = vld [vmem:[#allocation3 + $0x164] ss:$16 sps:$4 sm:$0xff]   ;;  %s236_s9 = scalar_lea.vmem %s2305_s0, %s1480_s6  ;;  %v1752_v45 = vld [vmem:[#allocation3 + $0x16c] ss:$16 sps:$4 sm:$0xff]   ;;  %v1754_v46 = vld [vmem:[#allocation3 + $0x160] ss:$16 sps:$4 sm:$0xff]  }
  0x45   : > { %v1755_v47 = vld [vmem:[#allocation3 + $0x168] ss:$16 sps:$4 sm:$0xff]   ;;  %v2049_v48 = vld [vmem:[%s236_s9] sm:$0xff]   ;;  %v1758_v51 = vld [vmem:[#allocation3 + $0x18c] ss:$16 sps:$4 sm:$0xff]   ;;  %s1477_s15 = sshll.u32 %s1982_s22, 4 }
  0x46   : > { %882 = vmatpush1.bf16.msra.mxu0 %v1712_v18  ;;  %968 = vmatpush1.bf16.msra.mxu1 %v1713_v19  ;;  %v2051_v49 = vld [vmem:[%s236_s9 + $0x8] ss:$0 sps:$4 sm:$0xff]   ;;  %v1756_v50 = vld [vmem:[#allocation3 + $0x184] ss:$16 sps:$4 sm:$0xff]   ;;  %v253_v52 = vshrl.u32 %v2049_v48, 16  ;;  %v255_v53 = vshll.u32 %v2049_v48, 16  ;;  %s2263_s26 = scalar_lea.hbm %s2310_s5, %s1477_s15 }
  0x47   : > { %883 = vmatprep.subr.bf16.mxu0 %v1714_v20  ;;  %969 = vmatprep.subr.bf16.mxu1 %v1716_v21  ;;  %v260_v54 = vshll.u32 %v2051_v49, 16  ;;  %vm251_vm0 = vsmask.f32 7424  ;;  %v1760_v56 = vld [vmem:[#allocation3 + $0x180] ss:$16 sps:$4 sm:$0xff]   ;;  %v1929_v19 = vmov 0  }
  0x48   : > { %v257_v55 = vrot.slane %v255_v53, 1  ;;  %v1761_v57 = vld [vmem:[#allocation3 + $0x188] ss:$16 sps:$4 sm:$0xff]   ;;  %v1762_v59 = vld [vmem:[#allocation3 + $0x1a4] ss:$16 sps:$4 sm:$0xff]   ;;  %s231_s16 = scalar_lea.vmem [#allocation6], %s230_s12 }
  0x49   : > { %v262_v58 = vrot.slane %v260_v54, 1  ;;  %v1764_v60 = vld [vmem:[#allocation3 + $0x1ac] ss:$16 sps:$4 sm:$0xff]   ;;  %v1766_v63 = vld [vmem:[#allocation3 + $0x1a0] ss:$16 sps:$4 sm:$0xff]   ;;  %s1304_s17 = sshll.u32 %s231_s16, 4  ;;  %s2265_s17 = int_to_ptr.vmem [resolvable:$true] %s1304_s17 }
  0x4a   : > { %884 = vmatpush1.bf16.msra.mxu0 %v1718_v22  ;;  %970 = vmatpush1.bf16.msra.mxu1 %v1719_v23  ;;  %v258_v61 = vor.u32 %v257_v55, %v253_v52  ;;  %v1767_v0 = vld [vmem:[#allocation3 + $0x1a8] ss:$16 sps:$4 sm:$0xff]   ;;  %v1768_v1 = vld [vmem:[#allocation3 + $0x1c4] ss:$16 sps:$4 sm:$0xff]   ;;  %v1770_v2 = vld [vmem:[#allocation3 + $0x1cc] ss:$16 sps:$4 sm:$0xff]  }
  0x4b   : > { %885 = vmatprep.subr.bf16.mxu0 %v1720_v24  ;;  %971 = vmatprep.subr.bf16.mxu1 %v1722_v25  ;;  %v1772_v3 = vld [vmem:[#allocation3 + $0x1c0] ss:$16 sps:$4 sm:$0xff]   ;;  %v1773_v4 = vld [vmem:[#allocation3 + $0x1c8] ss:$16 sps:$4 sm:$0xff]   ;;  %v1774_v5 = vld [vmem:[#allocation3 + $0x1e4] ss:$16 sps:$4 sm:$0xff]  }
  0x4c   : > { %v263_v62 = vsel %vm251_vm0, %v258_v61, %v262_v58  ;;  %v1776_v6 = vld [vmem:[#allocation3 + $0x1ec] ss:$16 sps:$4 sm:$0xff]   ;;  %v1778_v7 = vld [vmem:[#allocation3 + $0x1e0] ss:$16 sps:$4 sm:$0xff]   ;;  %v1779_v8 = vld [vmem:[#allocation3 + $0x1e8] ss:$16 sps:$4 sm:$0xff]  }
  0x4d   : > { %905 = vmatprep.mubr.bf16.mxu0 %v263_v62  ;;  %991 = vmatprep.mubr.bf16.mxu1 %v263_v62  ;;  %v1784_v9 = vld [vmem:[#allocation3 + $0x204] ss:$16 sps:$4 sm:$0xff]   ;;  %v1787_v10 = vld [vmem:[#allocation3 + $0x20c] ss:$16 sps:$4 sm:$0xff]   ;;  %v1782_v11 = vld [vmem:[#allocation3 + $0x200] ss:$16 sps:$4 sm:$0xff]  }
  0x4e   : > { %886 = vmatpush1.bf16.msra.mxu0 %v1724_v26  ;;  %972 = vmatpush1.bf16.msra.mxu1 %v1725_v27  ;;  %v1785_v12 = vld [vmem:[#allocation3 + $0x208] ss:$16 sps:$4 sm:$0xff]   ;;  %v1790_v13 = vld [vmem:[#allocation3 + $0x224] ss:$16 sps:$4 sm:$0xff]   ;;  %v1793_v14 = vld [vmem:[#allocation3 + $0x22c] ss:$16 sps:$4 sm:$0xff]  }
  0x4f   : > { %887 = vmatprep.subr.bf16.mxu0 %v1726_v28  ;;  %973 = vmatprep.subr.bf16.mxu1 %v1728_v29  ;;  %v1788_v15 = vld [vmem:[#allocation3 + $0x220] ss:$16 sps:$4 sm:$0xff]   ;;  %v1791_v16 = vld [vmem:[#allocation3 + $0x228] ss:$16 sps:$4 sm:$0xff]   ;;  %v1796_v17 = vld [vmem:[#allocation3 + $0x244] ss:$16 sps:$4 sm:$0xff]  }
  0x50   : > { %v1799_v18 = vld [vmem:[#allocation3 + $0x24c] ss:$16 sps:$4 sm:$0xff]   ;;  %v1794_v20 = vld [vmem:[#allocation3 + $0x240] ss:$16 sps:$4 sm:$0xff]   ;;  %v1797_v21 = vld [vmem:[#allocation3 + $0x248] ss:$16 sps:$4 sm:$0xff]  }
  0x51   : > { %v1802_v22 = vld [vmem:[#allocation3 + $0x264] ss:$16 sps:$4 sm:$0xff]   ;;  %v1805_v23 = vld [vmem:[#allocation3 + $0x26c] ss:$16 sps:$4 sm:$0xff]   ;;  %v1800_v24 = vld [vmem:[#allocation3 + $0x260] ss:$16 sps:$4 sm:$0xff]  }
  0x52   : > { %888 = vmatpush1.bf16.msra.mxu0 %v1730_v30  ;;  %974 = vmatpush1.bf16.msra.mxu1 %v1731_v31  ;;  %v1803_v25 = vld [vmem:[#allocation3 + $0x268] ss:$16 sps:$4 sm:$0xff]   ;;  %v1808_v26 = vld [vmem:[#allocation3 + $0x284] ss:$16 sps:$4 sm:$0xff]   ;;  %v1811_v27 = vld [vmem:[#allocation3 + $0x28c] ss:$16 sps:$4 sm:$0xff]  }
  0x53   : > { %889 = vmatprep.subr.bf16.mxu0 %v1732_v32  ;;  %975 = vmatprep.subr.bf16.mxu1 %v1734_v33  ;;  %v1806_v28 = vld [vmem:[#allocation3 + $0x280] ss:$16 sps:$4 sm:$0xff]   ;;  %v1809_v29 = vld [vmem:[#allocation3 + $0x288] ss:$16 sps:$4 sm:$0xff]   ;;  %v1814_v30 = vld [vmem:[#allocation3 + $0x2a4] ss:$16 sps:$4 sm:$0xff]  }
  0x54   : > { %v1817_v31 = vld [vmem:[#allocation3 + $0x2ac] ss:$16 sps:$4 sm:$0xff]   ;;  %v1812_v32 = vld [vmem:[#allocation3 + $0x2a0] ss:$16 sps:$4 sm:$0xff]   ;;  %v1815_v33 = vld [vmem:[#allocation3 + $0x2a8] ss:$16 sps:$4 sm:$0xff]  }
  0x55   : > { %v1117_v54 = vld [vmem:[%s2308_s3 + $0x100] sm:$0xff]  ;;  %v1104_v55 = vld [vmem:[%s2308_s3 + $0x98] sm:$0xff]  ;;  %v1087_v61 = vld [vmem:[%s2308_s3 + $0x10] sm:$0xff]  ;;  %s1292_s30 = scalar_lea.sflag [#allocation5], %s230_s12  ;;  %s1858_s6 = scalar_lea.vmem %s2265_s17, 16 }
  0x56   : > { %890 = vmatpush1.bf16.msra.mxu0 %v1736_v34  ;;  %976 = vmatpush1.bf16.msra.mxu1 %v1737_v35  ;;  %v1820_v34 = vld [vmem:[#allocation3 + $0x2c4] ss:$16 sps:$4 sm:$0xff]   ;;  %v1823_v35 = vld [vmem:[#allocation3 + $0x2cc] ss:$16 sps:$4 sm:$0xff]   ;;  %p1859_p6 = scmp.ne.s32.totalorder %s2265_s17, %s1858_s6  ;;  %p2321_p9 = scmp.ne.s32.totalorder %s2314_s28, 0 }
  0x57   : > { %891 = vmatprep.subr.bf16.mxu0 %v1738_v36  ;;  %977 = vmatprep.subr.bf16.mxu1 %v1740_v37  ;;  %v1818_v36 = vld [vmem:[#allocation3 + $0x2c0] ss:$16 sps:$4 sm:$0xff]   ;;  %v1821_v37 = vld [vmem:[#allocation3 + $0x2c8] ss:$16 sps:$4 sm:$0xff]   ;;  %s1930_s22 = smov [#allocation6]  }
  0x58   : > { %p1860_p10 = pnand %p1859_p6, %p2321_p9  ;;  %s1862_s7 = sshll.u32 %s1930_s22, 4  ;;  %s1863_s7 = int_to_ptr.vmem [resolvable:$false] %s1862_s7 }
  0x59   : > { %s1864_s8 = scalar_lea.vmem %s1863_s7, 32  ;;  %p1865_p2 = scmp.lt.s32.totalorder %s2265_s17, %s1863_s7 }
  0x5a   : > { %892 = vmatpush1.bf16.msra.mxu0 %v1742_v38  ;;  %978 = vmatpush1.bf16.msra.mxu1 %v1743_v39  ;;  %v1826_v38 = vld [vmem:[#allocation3 + $0x2e4] ss:$16 sps:$4 sm:$0xff]   ;;  %v1829_v39 = vld [vmem:[#allocation3 + $0x2ec] ss:$16 sps:$4 sm:$0xff]   ;;  %p1861_p12 = pneg %p1860_p10  ;;  %p1866_p3 = scmp.lt.s32.totalorder %s1864_s8, %s1858_s6 }
  0x5b   : > { %893 = vmatprep.subr.bf16.mxu0 %v1744_v40  ;;  %979 = vmatprep.subr.bf16.mxu1 %v1746_v41  ;;  %v1101_v40 = vld [vmem:[%s2308_s3 + $0x80] sm:$0xff]  ;;  %v1102_v41 = vld [vmem:[%s2308_s3 + $0x88] sm:$0xff] }
  0x5c   : > { %v1551_v52 = vpack.c.bf16 %v1102_v41, %v1101_v40  ;;  %v1111_v41 = vld [vmem:[%s2308_s3 + $0xd0] sm:$0xff]  ;;  %p1867_p4 = por %p1866_p3, %p1865_p2 }
  0x5e   : > { %894 = vmatpush1.bf16.msra.mxu0 %v1748_v42  ;;  %980 = vmatpush1.bf16.msra.mxu1 %v1749_v43  ;;  %v1133_v42 = vld [vmem:[%s2308_s3 + $0x180] sm:$0xff]  ;;  %v1134_v43 = vld [vmem:[%s2308_s3 + $0x188] sm:$0xff]  ;;  %p1868_p7 = pnand %p1867_p4, %p1861_p12 }
  0x5f   : > { %895 = vmatprep.subr.bf16.mxu0 %v1750_v44  ;;  %981 = vmatprep.subr.bf16.mxu1 %v1752_v45  ;;  %v1824_v44 = vld [vmem:[#allocation3 + $0x2e0] ss:$16 sps:$4 sm:$0xff]   ;;  %v1827_v45 = vld [vmem:[#allocation3 + $0x2e8] ss:$16 sps:$4 sm:$0xff]   ;;  %v1583_v53 = vpack.c.bf16 %v1134_v43, %v1133_v42 }
  0x60   : > { %v1112_v42 = vld [vmem:[%s2308_s3 + $0xd8] sm:$0xff]  ;;  %v1143_v43 = vld [vmem:[%s2308_s3 + $0x1d0] sm:$0xff] }
  0x62   : > { %896 = vmatpush1.bf16.msra.mxu0 %v1754_v46  ;;  %982 = vmatpush1.bf16.msra.mxu1 %v1755_v47  ;;  %v267_v46 = vrot.slane %v2049_v48, 1  ;;  %v268_v47 = vrot.slane %v2051_v49, 1  ;;  %v1103_v49 = vld [vmem:[%s2308_s3 + $0x90] sm:$0xff] }
  0x63   : > { %897 = vmatprep.subr.bf16.mxu0 %v1756_v50  ;;  %983 = vmatprep.subr.bf16.mxu1 %v1758_v51  ;;  %v1085_v50 = vld [vmem:[%s2308_s3] sm:$0xff]  ;;  %v1086_v51 = vld [vmem:[%s2308_s3 + $0x8] sm:$0xff]  ;;  %v1555_v62 = vpack.c.bf16 %v1104_v55, %v1103_v49 }
  0x64   : > { %v269_v58 = vsel %vm266_vm1, %v267_v46, %v268_v47  ;;  %v1095_v46 = vld [vmem:[%s2308_s3 + $0x50] sm:$0xff]  ;;  %v1096_v47 = vld [vmem:[%s2308_s3 + $0x58] sm:$0xff]  ;;  %v1114_v49 = vld [vmem:[%s2308_s3 + $0xe8] sm:$0xff] }
  0x65   : > { %v1145_v55 = vld [vmem:[%s2308_s3 + $0x1e0] sm:$0xff] }
  0x66   : > { %898 = vmatpush1.bf16.msra.mxu0 %v1760_v56  ;;  %984 = vmatpush1.bf16.msra.mxu1 %v1761_v57  ;;  %v1135_v56 = vld [vmem:[%s2308_s3 + $0x190] sm:$0xff]  ;;  %v1136_v57 = vld [vmem:[%s2308_s3 + $0x198] sm:$0xff] }
  0x67   : > { %899 = vmatprep.subr.bf16.mxu0 %v1762_v59  ;;  %985 = vmatprep.subr.bf16.mxu1 %v1764_v60  ;;  %v1553_v59 = vpack.c.bf16 %v1086_v51, %v1085_v50  ;;  %v1573_v51 = vpack.c.bf16 %v1096_v47, %v1095_v46 }
  0x6a   : > { %900 = vmatpush1.bf16.msra.mxu0 %v1766_v63  ;;  %986 = vmatpush1.bf16.msra.mxu1 %v1767_v0  ;;  %v1587_v63 = vpack.c.bf16 %v1136_v57, %v1135_v56  ;;  %v1088_v0 = vld [vmem:[%s2308_s3 + $0x18] sm:$0xff]  ;;  %v1146_v57 = vld [vmem:[%s2308_s3 + $0x1e8] sm:$0xff] }
  0x6b   : > { %901 = vmatprep.subr.bf16.mxu0 %v1768_v1  ;;  %987 = vmatprep.subr.bf16.mxu1 %v1770_v2  ;;  %v1119_v1 = vld [vmem:[%s2308_s3 + $0x110] sm:$0xff]  ;;  %v1120_v2 = vld [vmem:[%s2308_s3 + $0x118] sm:$0xff] }
  0x6e   : > { %902 = vmatpush1.bf16.msra.mxu0 %v1772_v3  ;;  %988 = vmatpush1.bf16.msra.mxu1 %v1773_v4  ;;  %v1557_v3 = vpack.c.bf16 %v1088_v0, %v1087_v61  ;;  %v1589_v4 = vpack.c.bf16 %v1120_v2, %v1119_v1  ;;  %v1115_v1 = vld [vmem:[%s2308_s3 + $0xf0] sm:$0xff]  ;;  %v1116_v2 = vld [vmem:[%s2308_s3 + $0xf8] sm:$0xff] }
  0x6f   : > { %903 = vmatprep.subr.bf16.mxu0 %v1774_v5  ;;  %989 = vmatprep.subr.bf16.mxu1 %v1776_v6  ;;  %v1105_v5 = vld [vmem:[%s2308_s3 + $0xa0] sm:$0xff]  ;;  %v1106_v6 = vld [vmem:[%s2308_s3 + $0xa8] sm:$0xff] }
  0x72   : > { %904 = vmatpush1.bf16.msra.mxu0 %v1778_v7  ;;  %990 = vmatpush1.bf16.msra.mxu1 %v1779_v8  ;;  %v1137_v7 = vld [vmem:[%s2308_s3 + $0x1a0] sm:$0xff]  ;;  %v1559_v8 = vpack.c.bf16 %v1106_v6, %v1105_v5  ;;  %v1148_v5 = vld [vmem:[%s2308_s3 + $0x1f8] sm:$0xff]  ;;  %v1099_v6 = vld [vmem:[%s2308_s3 + $0x70] sm:$0xff] }
  0x73   : > { %916 = vmatprep.subr.bf16.mxu0 %v1784_v9  ;;  %1002 = vmatprep.subr.bf16.mxu1 %v1787_v10  ;;  %v1138_v9 = vld [vmem:[%s2308_s3 + $0x1a8] sm:$0xff]  ;;  %v1089_v10 = vld [vmem:[%s2308_s3 + $0x20] sm:$0xff] }
  0x75   : > { %906 = vmatmul.mubr.bf16.vlgmr.msra.gmra.mrb[0].mxu0 %v2049_v48  ;;  %992 = vmatmul.mubr.bf16.vlgmr.msra.gmra.mrb[0].mxu1 %v2049_v48  ;;  %v1118_v48 = vld [vmem:[%s2308_s3 + $0x108] sm:$0xff] }
  0x76   : > { %917 = vmatpush1.bf16.msra.mxu0 %v1782_v11  ;;  %1003 = vmatpush1.bf16.msra.mxu1 %v1785_v12  ;;  %v1585_v60 = vpack.c.bf16 %v1118_v48, %v1117_v54  ;;  %v1090_v11 = vld [vmem:[%s2308_s3 + $0x28] sm:$0xff]  ;;  %v1591_v12 = vpack.c.bf16 %v1138_v9, %v1137_v7  ;;  %v1113_v48 = vld [vmem:[%s2308_s3 + $0xe0] sm:$0xff]  ;;  %v1100_v7 = vld [vmem:[%s2308_s3 + $0x78] sm:$0xff] }
  0x77   : > { %918 = vmatprep.subr.bf16.mxu0 %v1790_v13  ;;  %1004 = vmatprep.subr.bf16.mxu1 %v1793_v14  ;;  %v1561_v13 = vpack.c.bf16 %v1090_v11, %v1089_v10  ;;  %v1121_v14 = vld [vmem:[%s2308_s3 + $0x120] sm:$0xff]  ;;  %v1575_v56 = vpack.c.bf16 %v1114_v49, %v1113_v48  ;;  %v1581_v9 = vpack.c.bf16 %v1100_v7, %v1099_v6  ;;  %v1131_v10 = vld [vmem:[%s2308_s3 + $0x170] sm:$0xff]  ;;  %v1132_v11 = vld [vmem:[%s2308_s3 + $0x178] sm:$0xff] }
  0x78   : > { %948 = vmatprep.mubr.bf16.mxu0 %v1929_v19  ;;  %1034 = vmatprep.mubr.bf16.mxu1 %v1929_v19  ;;  %v1139_v19 = vld [vmem:[%s2308_s3 + $0x1b0] sm:$0xff] }
  0x7a   : > { %919 = vmatpush1.bf16.msra.mxu0 %v1788_v15  ;;  %1005 = vmatpush1.bf16.msra.mxu1 %v1791_v16  ;;  %v1122_v15 = vld [vmem:[%s2308_s3 + $0x128] sm:$0xff] }
  0x7b   : > { %920 = vmatprep.subr.bf16.mxu0 %v1796_v17  ;;  %1006 = vmatprep.subr.bf16.mxu1 %v1799_v18  ;;  %v1593_v16 = vpack.c.bf16 %v1122_v15, %v1121_v14  ;;  %v1107_v17 = vld [vmem:[%s2308_s3 + $0xb0] sm:$0xff]  ;;  %v1108_v18 = vld [vmem:[%s2308_s3 + $0xb8] sm:$0xff] }
  0x7e   : > { %921 = vmatpush1.bf16.msra.mxu0 %v1794_v20  ;;  %1007 = vmatpush1.bf16.msra.mxu1 %v1797_v21  ;;  %v1563_v20 = vpack.c.bf16 %v1108_v18, %v1107_v17  ;;  %v1140_v21 = vld [vmem:[%s2308_s3 + $0x1b8] sm:$0xff]  ;;  %v371_v17 = vld [vmem:[%s2307_s2] sm:$0xf] }
  0x7f   : > { %922 = vmatprep.subr.bf16.mxu0 %v1802_v22  ;;  %1008 = vmatprep.subr.bf16.mxu1 %v1805_v23  ;;  %v1091_v22 = vld [vmem:[%s2308_s3 + $0x30] sm:$0xff]  ;;  %v1092_v23 = vld [vmem:[%s2308_s3 + $0x38] sm:$0xff] }
  0x82   : > { %923 = vmatpush1.bf16.msra.mxu0 %v1800_v24  ;;  %1009 = vmatpush1.bf16.msra.mxu1 %v1803_v25  ;;  %v1595_v24 = vpack.c.bf16 %v1140_v21, %v1139_v19  ;;  %v1565_v25 = vpack.c.bf16 %v1092_v23, %v1091_v22 }
  0x83   : > { %924 = vmatprep.subr.bf16.mxu0 %v1808_v26  ;;  %1010 = vmatprep.subr.bf16.mxu1 %v1811_v27  ;;  %v1123_v26 = vld [vmem:[%s2308_s3 + $0x130] sm:$0xff]  ;;  %v1124_v27 = vld [vmem:[%s2308_s3 + $0x138] sm:$0xff] }
  0x86   : > { %925 = vmatpush1.bf16.msra.mxu0 %v1806_v28  ;;  %1011 = vmatpush1.bf16.msra.mxu1 %v1809_v29  ;;  %v1597_v28 = vpack.c.bf16 %v1124_v27, %v1123_v26  ;;  %v1109_v29 = vld [vmem:[%s2308_s3 + $0xc0] sm:$0xff] }
  0x87   : > { %926 = vmatprep.subr.bf16.mxu0 %v1814_v30  ;;  %1012 = vmatprep.subr.bf16.mxu1 %v1817_v31  ;;  %v1110_v30 = vld [vmem:[%s2308_s3 + $0xc8] sm:$0xff]  ;;  %v1141_v31 = vld [vmem:[%s2308_s3 + $0x1c0] sm:$0xff] }
  0x8a   : > { %927 = vmatpush1.bf16.msra.mxu0 %v1812_v32  ;;  %1013 = vmatpush1.bf16.msra.mxu1 %v1815_v33  ;;  %v1567_v32 = vpack.c.bf16 %v1110_v30, %v1109_v29  ;;  %v1142_v33 = vld [vmem:[%s2308_s3 + $0x1c8] sm:$0xff] }
  0x8b   : > { %928 = vmatprep.subr.bf16.mxu0 %v1820_v34  ;;  %1014 = vmatprep.subr.bf16.mxu1 %v1823_v35  ;;  %v1093_v34 = vld [vmem:[%s2308_s3 + $0x40] sm:$0xff]  ;;  %v1094_v35 = vld [vmem:[%s2308_s3 + $0x48] sm:$0xff] }
  0x8e   : > { %929 = vmatpush1.bf16.msra.mxu0 %v1818_v36  ;;  %1015 = vmatpush1.bf16.msra.mxu1 %v1821_v37  ;;  %v1599_v36 = vpack.c.bf16 %v1142_v33, %v1141_v31  ;;  %v1569_v37 = vpack.c.bf16 %v1094_v35, %v1093_v34 }
  0x8f   : > { %930 = vmatprep.subr.bf16.mxu0 %v1826_v38  ;;  %1016 = vmatprep.subr.bf16.mxu1 %v1829_v39  ;;  %v1125_v38 = vld [vmem:[%s2308_s3 + $0x140] sm:$0xff]  ;;  %v1126_v39 = vld [vmem:[%s2308_s3 + $0x148] sm:$0xff] }
  0x90   : > { %v1601_v40 = vpack.c.bf16 %v1126_v39, %v1125_v38 }
  0x92   : > { %931 = vmatpush1.bf16.msra.mxu0 %v1824_v44  ;;  %1017 = vmatpush1.bf16.msra.mxu1 %v1827_v45  ;;  %v1571_v44 = vpack.c.bf16 %v1112_v42, %v1111_v41  ;;  %v1144_v45 = vld [vmem:[%s2308_s3 + $0x1d8] sm:$0xff] }
  0x93   : > { %1552 = vmatprep.subr.bf16.mxu0 %v1551_v52  ;;  %1584 = vmatprep.subr.bf16.mxu1 %v1583_v53  ;;  %v1603_v50 = vpack.c.bf16 %v1144_v45, %v1143_v43  ;;  %v1127_v52 = vld [vmem:[%s2308_s3 + $0x150] sm:$0xff]  ;;  %v1128_v53 = vld [vmem:[%s2308_s3 + $0x158] sm:$0xff] }
  0x94   : > { %v1605_v54 = vpack.c.bf16 %v1128_v53, %v1127_v52 }
  0x95   : > { %949 = vmatmul.mubr.bf16.vlgmr.msra.gmra.mrb[0].mxu0 %v269_v58  ;;  %1035 = vmatmul.mubr.bf16.vlgmr.msra.gmra.mrb[0].mxu1 %v269_v58  ;;  %v1097_v58 = vld [vmem:[%s2308_s3 + $0x60] sm:$0xff] }
  0x96   : > { %1554 = vmatpush3.bf16.msra.mxu0 %v1553_v59  ;;  %1586 = vmatpush3.bf16.msra.mxu1 %v1585_v60  ;;  %v1098_v59 = vld [vmem:[%s2308_s3 + $0x68] sm:$0xff]  ;;  %v1607_v60 = vpack.c.bf16 %v1146_v57, %v1145_v55 }
  0x97   : > { %1556 = vmatprep.subr.bf16.mxu0 %v1555_v62  ;;  %1588 = vmatprep.subr.bf16.mxu1 %v1587_v63  ;;  %v1577_v61 = vpack.c.bf16 %v1098_v59, %v1097_v58  ;;  %v1129_v62 = vld [vmem:[%s2308_s3 + $0x160] sm:$0xff]  ;;  %v1130_v63 = vld [vmem:[%s2308_s3 + $0x168] sm:$0xff] }
  0x98   : > { %v1609_v0 = vpack.c.bf16 %v1130_v63, %v1129_v62 }
  0x9a   : > { %1558 = vmatpush3.bf16.msra.mxu0 %v1557_v3  ;;  %1590 = vmatpush3.bf16.msra.mxu1 %v1589_v4  ;;  %v1147_v3 = vld [vmem:[%s2308_s3 + $0x1f0] sm:$0xff]  ;;  %v1579_v4 = vpack.c.bf16 %v1116_v2, %v1115_v1 }
  0x9b   : > { %1560 = vmatprep.subr.bf16.mxu0 %v1559_v8  ;;  %1592 = vmatprep.subr.bf16.mxu1 %v1591_v12  ;;  %v1611_v8 = vpack.c.bf16 %v1148_v5, %v1147_v3  ;;  %v1613_v12 = vpack.c.bf16 %v1132_v11, %v1131_v10 }
  0x9e   : > { %1562 = vmatpush3.bf16.msra.mxu0 %v1561_v13  ;;  %1594 = vmatpush3.bf16.msra.mxu1 %v1593_v16  ;;  %v373_v13 = vlaneseq }
  0x9f   : > { %1564 = vmatprep.subr.bf16.mxu0 %v1563_v20  ;;  %1596 = vmatprep.subr.bf16.mxu1 %v1595_v24 }
  0xa0   : > { %v374_v14 = vshrl.u32 %v373_v13, 7 }
  0xa2   : > { %1566 = vmatpush3.bf16.msra.mxu0 %v1565_v25  ;;  %1598 = vmatpush3.bf16.msra.mxu1 %v1597_v28  ;;  %v375_v15 = vsub.s32 0, %v374_v14  ;;  %v383_v16 = vsub.s32 2, %v374_v14  ;;  %v379_v18 = vsub.s32 1, %v374_v14  ;;  %v387_v19 = vsub.s32 3, %v374_v14 }
  0xa3   : > { %1568 = vmatprep.subr.bf16.mxu0 %v1567_v32  ;;  %1600 = vmatprep.subr.bf16.mxu1 %v1599_v36 }
  0xa4   : > { %v376_v20 = vrot.slane %v371_v17, %v375_v15  ;;  %v384_v21 = vrot.slane %v371_v17, %v383_v16  ;;  %v380_v22 = vrot.slane %v371_v17, %v379_v18  ;;  %v388_v23 = vrot.slane %v371_v17, %v387_v19  ;;  %v1149_v18 = vld [vmem:[%s2309_s4] sm:$0x1] }
  0xa6   : > { %1570 = vmatpush3.bf16.msra.mxu0 %v1569_v37  ;;  %1602 = vmatpush3.bf16.msra.mxu1 %v1601_v40 }
  0xa7   : > { %1572 = vmatprep.subr.bf16.mxu0 %v1571_v44  ;;  %1604 = vmatprep.subr.bf16.mxu1 %v1603_v50 }
  0xaa   : > { %1574 = vmatpush3.bf16.msra.mxu0 %v1573_v51  ;;  %1606 = vmatpush3.bf16.msra.mxu1 %v1605_v54 }
  0xab   : > { %1576 = vmatprep.subr.bf16.mxu0 %v1575_v56  ;;  %1608 = vmatprep.subr.bf16.mxu1 %v1607_v60 }
  0xae   : > { %1578 = vmatpush3.bf16.msra.mxu0 %v1577_v61  ;;  %1610 = vmatpush3.bf16.msra.mxu1 %v1609_v0 }
  0xaf   : > { %1580 = vmatprep.subr.bf16.mxu0 %v1579_v4  ;;  %1612 = vmatprep.subr.bf16.mxu1 %v1611_v8 }
  0xb2   : > { %1582 = vmatpush3.bf16.msra.mxu0 %v1581_v9  ;;  %1614 = vmatpush3.bf16.msra.mxu1 %v1613_v12 }
 0x168   : > { %v950_v24 = vpop.f32.mrb[0].mxu0  ;;  %v1036_v25 = vpop.f32.mrb[0].mxu1 }
 0x169   : > { %v1615_v26 = vadd.f32 %v950_v24, %v376_v20  ;;  %v1619_v27 = vadd.f32 %v1036_v25, %v384_v21  ;;  %v952_v28 = vpop.f32.mrb[1].mxu0  ;;  %v1038_v29 = vpop.f32.mrb[1].mxu1 }
 0x16a   : > { %v1616_v30 = vadd.f32 %v952_v28, %v380_v22  ;;  %v1620_v31 = vadd.f32 %v1038_v29, %v388_v23  ;;  %v954_v32 = vpop.f32.mrb[2].mxu0  ;;  %v1040_v33 = vpop.f32.mrb[2].mxu1 }
 0x16b   : > { %v1617_v34 = vadd.f32 %v954_v32, %v376_v20  ;;  %v1621_v35 = vadd.f32 %v1040_v33, %v384_v21  ;;  %v956_v36 = vpop.f32.mrb[3].mxu0  ;;  %v1042_v37 = vpop.f32.mrb[3].mxu1  ;;  %v1045_v40 = vmax.f32 %v1615_v26, 0.0  ;;  %v1047_v41 = vmax.f32 %v1619_v27, 0.0 }
 0x16c   : > { %v1618_v38 = vadd.f32 %v956_v36, %v380_v22  ;;  %v1622_v39 = vadd.f32 %v1042_v37, %v388_v23  ;;  %v1046_v44 = vmax.f32 %v1616_v30, 0.0  ;;  %v1048_v45 = vmax.f32 %v1620_v31, 0.0 }
 0x16d   : > { %v1049_v42 = vmax.f32 %v1617_v34, 0.0  ;;  %v1051_v43 = vmax.f32 %v1621_v35, 0.0 }
 0x16e   : > { %v1050_v46 = vmax.f32 %v1618_v38, 0.0  ;;  %v1052_v47 = vmax.f32 %v1622_v39, 0.0 }
 0x16f   : > { %v1053_v50 = vadd.f32 %v1049_v42, %v1045_v40  ;;  %v1067_v51 = vadd.f32 %v1051_v43, %v1047_v41 }
 0x170   : > { %v1060_v52 = vadd.f32 %v1050_v46, %v1046_v44  ;;  %v1074_v53 = vadd.f32 %v1052_v47, %v1048_v45 }
 0x171   : > { %v1054_v54 = vrot.slane %v1053_v50, 4  ;;  %v1068_v48 = vrot.slane %v1067_v51, 4 }
 0x172   : > { %v1061_v49 = vrot.slane %v1060_v52, 4  ;;  %v1075_v55 = vrot.slane %v1074_v53, 4 }
 0x173   : > { %v1055_v56 = vadd.f32 %v1054_v54, %v1053_v50  ;;  %v1069_v57 = vadd.f32 %v1068_v48, %v1067_v51 }
 0x174   : > { %v1062_v58 = vadd.f32 %v1061_v49, %v1060_v52  ;;  %v1076_v59 = vadd.f32 %v1075_v55, %v1074_v53 }
 0x175   : > { %v1056_v60 = vrot.slane %v1055_v56, 2  ;;  %v1070_v61 = vrot.slane %v1069_v57, 2 }
 0x176   : > { %v1063_v62 = vrot.slane %v1062_v58, 2  ;;  %v1077_v63 = vrot.slane %v1076_v59, 2 }
 0x177   : > { %v1057_v0 = vadd.f32 %v1056_v60, %v1055_v56  ;;  %v1071_v1 = vadd.f32 %v1070_v61, %v1069_v57 }
 0x178   : > { %v1064_v2 = vadd.f32 %v1063_v62, %v1062_v58  ;;  %v1078_v3 = vadd.f32 %v1077_v63, %v1076_v59 }
 0x179   : > { %v1058_v4 = vrot.slane %v1057_v0, 1  ;;  %v1072_v5 = vrot.slane %v1071_v1, 1 }
 0x17a   : > { %v1065_v6 = vrot.slane %v1064_v2, 1  ;;  %v1079_v7 = vrot.slane %v1078_v3, 1 }
 0x17b   : > { %v1059_v8 = vadd.f32 %v1058_v4, %v1057_v0  ;;  %v1073_v9 = vadd.f32 %v1072_v5, %v1071_v1 }
 0x17c   : > { %v1066_v10 = vadd.f32 %v1065_v6, %v1064_v2  ;;  %v1080_v11 = vadd.f32 %v1079_v7, %v1078_v3 }
 0x17d   : > { %v1081_v14 = vmul.f32 0.00390625, %v1059_v8  ;;  %v1083_v15 = vmul.f32 0.00390625, %v1073_v9 }
 0x17e   : > { %v1082_v12 = vmul.f32 0.00390625, %v1066_v10  ;;  %v1084_v13 = vmul.f32 0.00390625, %v1080_v11 }
 0x180   : > { %1214 = vmatprep.mubr.f32.mxu0 %v1082_v12  ;;  %1284 = vmatprep.mubr.f32.mxu1 %v1084_v13 }
 0x181   : > { %1215 = vmatmul.mubr.f32.vlgmr.msra.gmra.mrb[4].mxu0 %v1081_v14  ;;  %1285 = vmatmul.mubr.f32.vlgmr.msra.gmra.mrb[4].mxu1 %v1083_v15 }
 0x254   : > { %v1513_v16 = vpop.f32.mrb[4].mxu0  ;;  %v1548_v17 = vpop.f32.mrb[4].mxu1 }
 0x255   : > { %v1514_v19 = vpop.f32.mrb[5].mxu0  ;;  %v1549_v20 = vpop.f32.mrb[5].mxu1 }
 0x256   : > { %v1515_v21 = vadd.f32 %v1514_v19, %v1513_v16  ;;  %v1550_v22 = vadd.f32 %v1549_v20, %v1548_v17 }
 0x258   : > { %v1217_v23 = vadd.f32 %v1515_v21, %v1149_v18 }
 0x25a   : > { %v1287_v24 = vadd.f32 %v1550_v22, %v1217_v23 }
 0x25c   : > { %1290 = vst [vmem:[%s231_s16] sm:$0x1] %v1287_v24 }
 0x25d   : > { %1871 = shalt.err (!%p1868_p7)
}
 0x25e   : > { %s1872_s9 = scalar_lea.hbm %s2263_s26, 16  ;;  %s1876_s12 = scalar_lea.hbm %s2310_s5, 32 }
 0x25f   : > { %p1873_p8 = scmp.ne.s32.totalorder %s2263_s26, %s1872_s9  ;;  %p1877_p1 = scmp.lt.u32.totalorder %s2263_s26, %s2310_s5 }
 0x260   : > { %p1878_p0 = scmp.lt.u32.totalorder %s1876_s12, %s1872_s9  ;;  %p1880_p6 = scmp.lt.u32.totalorder %s1872_s9, %s2263_s26 }
 0x261   : > { %p1874_p11 = pnand %p1873_p8, %p2321_p9 }
 0x262   : > { %p1879_p5 = por %p1878_p0, %p1877_p1 }
 0x263   : > { %p1875_p13 = pneg %p1874_p11 }
 0x264   : > { %p1881_p10 = por %p1880_p6, %p1879_p5 }
 0x266   : > { %p1882_p12 = pnand %p1881_p10, %p1875_p13 }
 0x268   : > { %1885 = shalt.err (!%p1882_p12)
}
 0x269   : > { %1635 = dma.vmem_to_hbm [thread:$0]  (%p2321_p9), %s2265_s17, 16, %s2263_s26, %s1292_s30  }
 0x26a PF: > { %p1647_p2 = scmp.ge.s32.totalorder %s1924_s21, 2  ;;  %s1316_s15 = sand.u32 1, %s1912_s18  }
 0x26b   : > { %p2322_p3 = scmp.ne.s32.totalorder %s2315_s29, 0  ;;  %s1317_s16 = scalar_lea.sflag [#allocation5], %s1316_s15 }
 0x26d   : > { %p1642_p4 = pnand %p1647_p2, %p2322_p3 }
 0x26f   : > { %1907 = dma.done.wait (!%p1642_p4), %s1317_s16, 16  }
 0x270   : > { %1909 = vsyncadd (!%p1642_p4), %s1317_s16, 4294967280  ;;  %p16_p7 = scmp.ge.s32.totalorder %s1986_s24, 4   ;;  %s2323_s18 = smov %s1916_s19 }
 0x271   : > { %s2324_s19 = smov %s1920_s20  ;;  %s2325_s20 = smov %s1997_s27 }
 0x272   : > { %s2326_s21 = smov %s1986_s24  ;;  %18 = sbr.rel (!%p16_p7) target bundleno = 4 (0x4), region = 80 }
 0x279   :  { %1321 = vsyncpa [#allocation4], 1 }
 0x27a   :  { %1323 = vsyncpa [#allocation4 + $0x1], 1 }
 0x27b   :  { %1324 = vsyncpa [#allocation5], 1 }
 0x27c   :  { %1326 = vsyncpa [#allocation5 + $0x1], 1 }

</bundles_post_ra>
